<compile_context>
chip_gen: v6e
topology: v6e:2x2x1
jax: 0.10.0
libtpu: 0.0.40
codegen_flags: <defaults>
</compile_context>

<pallas_src>
import functools
import math

import jax
import jax.numpy as jnp
from jax.experimental import pallas as pl
from jax.experimental.pallas import tpu as pltpu


def _cdiv(a, b):
    return -(-a // b)


def _round_up(x, m):
    return ((x + m - 1) // m) * m


@functools.lru_cache(maxsize=None)
def _vmem_cap_bytes():
    """~85% of this generation's physical VMEM (v5e/v6e 128 MiB, v7x 64 MiB)."""
    cap = None
    try:
        info = pltpu.get_tpu_info()
        cap = getattr(info, "vmem_capacity_bytes", None)
    except Exception:
        cap = None
    if not cap:
        cap = 64 << 20  # conservative fallback: v7x physical VMEM
    return int(cap * 0.85)


def _resident_spec(block_shape, index_map):
    """BlockSpec for a VMEM-resident operand (constant index_map).

    Single-buffer it: double buffering a block whose index never changes buys
    nothing and doubles its VMEM footprint.  Falls back to the default spec on
    JAX versions without pipeline_mode support.
    """
    if hasattr(pl, "Buffered"):
        try:
            return pl.BlockSpec(block_shape, index_map,
                                pipeline_mode=pl.Buffered(1))
        except TypeError:
            pass
    return pl.BlockSpec(block_shape, index_map)


def _pick_tile_rows(n_rows, tn_max, desired):
    """Largest VMEM-safe row tile; MXU-friendly rounding; even tile count."""
    n8 = _round_up(max(n_rows, 1), 8)
    tn_max = max((tn_max // 8) * 8, 8)
    tn = min(_round_up(max(int(desired), 8), 8), tn_max, n8)
    for m in (256, 128):          # v6e/v7x MXU is 256 wide; keep M tiles full
        if tn >= m:
            tn = (tn // m) * m
            break
    tn = max((tn // 8) * 8, 8)
    tiles = _cdiv(n8, tn)
    if tiles > 1 and tiles % 2 == 1:   # v7x megacore: prefer an even tile count
        for t in (tiles + 1, tiles - 1):
            cand = _round_up(_cdiv(n8, t), 8)
            if 8 <= cand <= tn_max and _cdiv(n8, cand) % 2 == 0:
                tn = cand
                break
    return tn


# --------------------------------------------------------------------------
# Kernels
# --------------------------------------------------------------------------
def _highway_resident_kernel(x_ref, w_ref, b_ref, o_ref, *, num_layers, d, d_pad):
    """All layers on one (tn, D) activation tile; stacked weights VMEM-resident.

    x_ref : (tn, D)         activation tile, caller dtype
    w_ref : (L, D, 2*Dp)    stacked weights (x @ W layout), nonlinear half in
                            columns [:D], gate half in columns [Dp:Dp+D]
    b_ref : (L, 1, 2*Dp)    stacked biases (f32)
    o_ref : (tn, D)         output tile, caller dtype
    """
    x = x_ref[...].astype(jnp.float32)
    for l in range(num_layers):          # static unroll; L is small
        proj = jnp.dot(x.astype(w_ref.dtype), w_ref[l],
                       preferred_element_type=jnp.float32) + b_ref[l]
        h = jnp.maximum(proj[:, :d], 0.0)                 # relu branch
        g = jax.nn.sigmoid(proj[:, d_pad:d_pad + d])      # gate (EUP)
        x = h + g * (x - h)                               # == g*x + (1-g)*h
    o_ref[...] = x.astype(o_ref.dtype)


def _highway_streamed_kernel(x_ref, w_ref, b_ref, o_ref, x_carry, *, d, d_pad):
    """One layer per grid step (layer axis innermost); activation carried in VMEM.

    Used when the stacked weights do not fit the per-generation VMEM budget:
    the next layer's weights DMA under the current layer's matmul.
    """
    layer = pl.program_id(1)

    @pl.when(layer == 0)
    def _():
        x_carry[...] = x_ref[...].astype(jnp.float32)

    x = x_carry[...]
    proj = jnp.dot(x.astype(w_ref.dtype), w_ref[0],
                   preferred_element_type=jnp.float32) + b_ref[0]
    h = jnp.maximum(proj[:, :d], 0.0)
    g = jax.nn.sigmoid(proj[:, d_pad:d_pad + d])
    x = h + g * (x - h)
    x_carry[...] = x

    @pl.when(layer == pl.num_programs(1) - 1)
    def _():
        o_ref[...] = x.astype(o_ref.dtype)


# --------------------------------------------------------------------------
# Parameter packing / wrapper
# --------------------------------------------------------------------------
def pack_highway_params(params, matmul_dtype=jnp.bfloat16):
    """Pack per-layer PyTorch-layout Linear params into kernel layout.

    params: list of (w_full (2D, D), b_full (2D,))  [nn.Linear(D, 2D) layout]
    Returns:
      w_stk: (L, D, 2*Dp) weights in x @ W layout, gate half at column Dp,
             cast to matmul_dtype (bf16 default: native MXU dtype on all gens)
      b_stk: (L, 1, 2*Dp)  biases, f32 (padding columns zero, never read)
    """
    L = len(params)
    D = params[0][0].shape[1]
    Dp = _round_up(D, 128)
    w_stk = jnp.zeros((L, D, 2 * Dp), jnp.float32)
    b_stk = jnp.zeros((L, 1, 2 * Dp), jnp.float32)
    for l, (w_full, b_full) in enumerate(params):
        w_stk = w_stk.at[l, :, :D].set(w_full[:D, :].T)          # nonlinear branch
        w_stk = w_stk.at[l, :, Dp:Dp + D].set(w_full[D:, :].T)   # gate branch
        b_stk = b_stk.at[l, 0, :D].set(b_full[:D])
        b_stk = b_stk.at[l, 0, Dp:Dp + D].set(b_full[D:])        # gate bias (=1 init)
    return w_stk.astype(matmul_dtype), b_stk


@functools.partial(jax.jit, static_argnames=("tile_n", "force_stream"))
def highway_forward(x, w_stk, b_stk, *, tile_n=512, force_stream=False):
    """x: (..., D).  w_stk/b_stk from pack_highway_params.  Output in x.dtype."""
    orig_shape = x.shape
    D = orig_shape[-1]
    L, Dw, two_dp = w_stk.shape
    Dp = two_dp // 2
    assert Dw == D, "weight stack feature dim mismatch"

    x2 = x.reshape(-1, D)             # leading-dim merge only: no HBM copy
    N = x2.shape[0]
    out_dtype = x.dtype

    cap = _vmem_cap_bytes()
    w_item = jnp.dtype(w_stk.dtype).itemsize
    x_item = jnp.dtype(x.dtype).itemsize
    o_item = jnp.dtype(out_dtype).itemsize

    resident_w = L * (D * 2 * Dp * w_item + 2 * Dp * 4)   # single-buffered stack
    layer_w = 2 * (D * 2 * Dp * w_item + 2 * Dp * 4)      # double-buffered 1 layer
    # Per-row VMEM: double-buffered in/out tiles + f32 intermediates + carry.
    per_row = 2 * D * (x_item + o_item) + 6 * Dp * 4 + D * (w_item + 4)
    slack = 4 << 20
    n8 = _round_up(max(N, 1), 8)

    use_stream = force_stream or (resident_w + per_row * min(n8, 128) + slack > cap)
    weights_vmem = layer_w if use_stream else resident_w
    weights_need = layer_w if use_stream else 2 * resident_w  # safe if Buffered(1) ignored

    avail = cap - weights_vmem - slack
    tn_max = max(avail // per_row, 8) if avail > 0 else 8
    tn = _pick_tile_rows(N, tn_max, tile_n)
    num_tiles = _cdiv(N, tn)

    need = weights_need + per_row * tn + slack
    vmem_limit = int(min(max(need, 32 << 20), cap))

    if not use_stream:
        kernel = functools.partial(_highway_resident_kernel,
                                   num_layers=L, d=D, d_pad=Dp)
        out = pl.pallas_call(
            kernel,
            out_shape=jax.ShapeDtypeStruct((N, D), out_dtype),
            grid_spec=pltpu.PrefetchScalarGridSpec(
                num_scalar_prefetch=0,
                grid=(num_tiles,),
                in_specs=[
                    pl.BlockSpec((tn, D), lambda i: (i, 0)),             # activations
                    _resident_spec((L, D, 2 * Dp), lambda i: (0, 0, 0)),  # weights
                    _resident_spec((L, 1, 2 * Dp), lambda i: (0, 0, 0)),  # biases
                ],
                out_specs=pl.BlockSpec((tn, D), lambda i: (i, 0)),
            ),
            compiler_params=pltpu.CompilerParams(
                dimension_semantics=("parallel",),
                vmem_limit_bytes=vmem_limit,
            ),
        )(x2, w_stk, b_stk)
    else:
        kernel = functools.partial(_highway_streamed_kernel, d=D, d_pad=Dp)
        out = pl.pallas_call(
            kernel,
            out_shape=jax.ShapeDtypeStruct((N, D), out_dtype),
            grid_spec=pltpu.PrefetchScalarGridSpec(
                num_scalar_prefetch=0,
                grid=(num_tiles, L),
                in_specs=[
                    pl.BlockSpec((tn, D), lambda i, l: (i, 0)),          # activations
                    pl.BlockSpec((1, D, 2 * Dp), lambda i, l: (l, 0, 0)),  # layer weights
                    pl.BlockSpec((1, 1, 2 * Dp), lambda i, l: (l, 0, 0)),  # layer bias
                ],
                out_specs=pl.BlockSpec((tn, D), lambda i, l: (i, 0)),
                scratch_shapes=[pltpu.VMEM((tn, D), jnp.float32)],
            ),
            compiler_params=pltpu.CompilerParams(
                dimension_semantics=("parallel", "arbitrary"),
                vmem_limit_bytes=vmem_limit,
            ),
        )(x2, w_stk, b_stk)

    return out.reshape(orig_shape)


# --------------------------------------------------------------------------
# Init / reference / test
# --------------------------------------------------------------------------
def init_highway_params(key, input_dim, num_layers=1):
    """Mirror nn.Linear(D, 2D) init per layer, gate-half bias filled with 1."""
    params = []
    bound = 1.0 / math.sqrt(input_dim)
    for l in range(num_layers):
        kw, kb = jax.random.split(jax.random.fold_in(key, l))
        w_full = jax.random.uniform(kw, (2 * input_dim, input_dim),
                                    minval=-bound, maxval=bound, dtype=jnp.float32)
        b_full = jax.random.uniform(kb, (2 * input_dim,),
                                    minval=-bound, maxval=bound, dtype=jnp.float32)
        b_full = b_full.at[input_dim:].set(1.0)   # gate bias -> 1
        params.append((w_full, b_full))
    return params


def highway_reference(x, params):
    """Pure-JAX reference matching the PyTorch forward (PyTorch param layout)."""
    D = x.shape[-1]
    for (w_full, b_full) in params:
        proj = x @ w_full.T + b_full
        h = jnp.maximum(proj[..., :D], 0.0)
        g = jax.nn.sigmoid(proj[..., D:])
        x = g * x + (1.0 - g) * h
    return x


if __name__ == "__main__":
    key = jax.random.PRNGKey(0)
    batch, seq, hidden = 2, 8, 32
    num_layers = 2

    kx, kp = jax.random.split(key)
    x = jax.random.normal(kx, (batch, seq, hidden), dtype=jnp.float32)
    params = init_highway_params(kp, hidden, num_layers=num_layers)
    ref = highway_reference(x, params)

    # 1) f32 weights, f32 activations (resident path): tight check.
    w32, b32 = pack_highway_params(params, matmul_dtype=jnp.float32)
    out = highway_forward(x, w32, b32)
    jax.block_until_ready(out)
    assert out.shape == x.shape and out.dtype == x.dtype
    assert jnp.allclose(out, ref, atol=1e-4, rtol=1e-4), "f32 mismatch vs reference"

    # 2) default bf16 weights (native MXU dtype on v5e/v6e/v7x): looser check.
    wbf, bbf = pack_highway_params(params)
    out_bf = highway_forward(x, wbf, bbf)
    jax.block_until_ready(out_bf)
    assert jnp.allclose(out_bf, ref, atol=5e-2, rtol=5e-2), "bf16-weight mismatch"

    # 3) bf16 activations in / bf16 out (halved HBM traffic in mem-bound regime).
    out_bb = highway_forward(x.astype(jnp.bfloat16), wbf, bbf)
    jax.block_until_ready(out_bb)
    assert out_bb.dtype == jnp.bfloat16
    assert jnp.allclose(out_bb.astype(jnp.float32), ref, atol=1e-1, rtol=1e-1), \
        "bf16 I/O mismatch"

    # 4) Ragged row count (no wrapper padding): masked boundary block.
    x_rag = jax.random.normal(jax.random.fold_in(key, 7), (3, 5, hidden),
                              dtype=jnp.float32)
    ref_rag = highway_reference(x_rag, params)
    out_rag = highway_forward(x_rag, w32, b32)
    jax.block_until_ready(out_rag)
    assert out_rag.shape == x_rag.shape
    assert jnp.allclose(out_rag, ref_rag, atol=1e-4, rtol=1e-4), "ragged-N mismatch"

    # 5) Layer-streaming fallback path (used automatically when the weight
    #    stack busts the per-generation VMEM budget, e.g. large D on v7x).
    out_st = highway_forward(x, w32, b32, force_stream=True)
    jax.block_until_ready(out_st)
    assert jnp.allclose(out_st, ref, atol=1e-4, rtol=1e-4), "streamed-path mismatch"

    print("KERNEL_OK")
</pallas_src>

<mosaic_0001>
module attributes {stable_mosaic.version = 11 : i64} {
  func.func @_highway_resident_kernel(%arg0: i32, %arg1: memref<16x32xf32, #tpu.memory_space<vmem>>, %arg2: memref<2x32x256xf32, #tpu.memory_space<vmem>>, %arg3: memref<2x1x256xf32, #tpu.memory_space<vmem>>, %arg4: memref<16x32xf32, #tpu.memory_space<vmem>>) attributes {dimension_semantics = [#tpu.dimension_semantics<parallel>], iteration_bounds = array<i64: 1>, scalar_prefetch = 0 : i64, scratch_operands = 0 : i64, tpu.core_type = #tpu.core_type<tc>, window_params = [{transform_indices = @transform_0, window_bounds = array<i64: 16, 32>}, {pipeline_mode = #tpu.pipeline_mode<synchronous>, transform_indices = @transform_1, window_bounds = array<i64: 2, 32, 256>}, {pipeline_mode = #tpu.pipeline_mode<synchronous>, transform_indices = @transform_2, window_bounds = array<i64: 2, 1, 256>}, {transform_indices = @transform_3, window_bounds = array<i64: 16, 32>}]} {
    %c0 = arith.constant 0 : index
    %c0_0 = arith.constant 0 : index
    %0 = vector.load %arg1[%c0, %c0_0] : memref<16x32xf32, #tpu.memory_space<vmem>>, vector<16x32xf32>
    %c0_1 = arith.constant 0 : index
    %c0_2 = arith.constant 0 : index
    %c0_3 = arith.constant 0 : index
    %1 = vector.load %arg2[%c0_1, %c0_2, %c0_3] : memref<2x32x256xf32, #tpu.memory_space<vmem>>, vector<1x32x256xf32>
    %2 = vector.shape_cast %1 : vector<1x32x256xf32> to vector<32x256xf32>
    %cst = arith.constant dense<0.000000e+00> : vector<16x256xf32>
    %3 = tpu.matmul %0, %2, %cst {dimension_numbers = #tpu.dot_dimension_numbers<[1], [0], [0], [1], [0, 0, 1, 1], [], []>} : vector<16x32xf32>, vector<32x256xf32>, vector<16x256xf32> -> vector<16x256xf32>
    %c0_4 = arith.constant 0 : index
    %c0_5 = arith.constant 0 : index
    %c0_6 = arith.constant 0 : index
    %4 = vector.load %arg3[%c0_4, %c0_5, %c0_6] : memref<2x1x256xf32, #tpu.memory_space<vmem>>, vector<1x1x256xf32>
    %5 = vector.shape_cast %4 : vector<1x1x256xf32> to vector<1x256xf32>
    %6 = vector.broadcast %5 : vector<1x256xf32> to vector<16x256xf32>
    %7 = arith.addf %3, %6 : vector<16x256xf32>
    %8 = vector.extract_strided_slice %7 {offsets = [0, 0], sizes = [16, 32], strides = [1, 1]} : vector<16x256xf32> to vector<16x32xf32>
    %cst_7 = arith.constant 0.000000e+00 : f32
    %9 = vector.broadcast %cst_7 : f32 to vector<16x32xf32>
    %10 = arith.maximumf %8, %9 : vector<16x32xf32>
    %11 = vector.extract_strided_slice %7 {offsets = [0, 128], sizes = [16, 32], strides = [1, 1]} : vector<16x256xf32> to vector<16x32xf32>
    %12 = arith.negf %11 : vector<16x32xf32>
    %13 = math.exp %12 : vector<16x32xf32>
    %cst_8 = arith.constant 1.000000e+00 : f32
    %14 = vector.broadcast %cst_8 : f32 to vector<16x32xf32>
    %15 = arith.addf %14, %13 : vector<16x32xf32>
    %16 = arith.divf %14, %15 : vector<16x32xf32>
    %17 = arith.subf %0, %10 : vector<16x32xf32>
    %18 = arith.mulf %16, %17 : vector<16x32xf32>
    %19 = arith.addf %10, %18 : vector<16x32xf32>
    %c1 = arith.constant 1 : index
    %c0_9 = arith.constant 0 : index
    %c0_10 = arith.constant 0 : index
    %20 = vector.load %arg2[%c1, %c0_9, %c0_10] : memref<2x32x256xf32, #tpu.memory_space<vmem>>, vector<1x32x256xf32>
    %21 = vector.shape_cast %20 : vector<1x32x256xf32> to vector<32x256xf32>
    %cst_11 = arith.constant dense<0.000000e+00> : vector<16x256xf32>
    %22 = tpu.matmul %19, %21, %cst_11 {dimension_numbers = #tpu.dot_dimension_numbers<[1], [0], [0], [1], [0, 0, 1, 1], [], []>} : vector<16x32xf32>, vector<32x256xf32>, vector<16x256xf32> -> vector<16x256xf32>
    %c1_12 = arith.constant 1 : index
    %c0_13 = arith.constant 0 : index
    %c0_14 = arith.constant 0 : index
    %23 = vector.load %arg3[%c1_12, %c0_13, %c0_14] : memref<2x1x256xf32, #tpu.memory_space<vmem>>, vector<1x1x256xf32>
    %24 = vector.shape_cast %23 : vector<1x1x256xf32> to vector<1x256xf32>
    %25 = vector.broadcast %24 : vector<1x256xf32> to vector<16x256xf32>
    %26 = arith.addf %22, %25 : vector<16x256xf32>
    %27 = vector.extract_strided_slice %26 {offsets = [0, 0], sizes = [16, 32], strides = [1, 1]} : vector<16x256xf32> to vector<16x32xf32>
    %cst_15 = arith.constant 0.000000e+00 : f32
    %28 = vector.broadcast %cst_15 : f32 to vector<16x32xf32>
    %29 = arith.maximumf %27, %28 : vector<16x32xf32>
    %30 = vector.extract_strided_slice %26 {offsets = [0, 128], sizes = [16, 32], strides = [1, 1]} : vector<16x256xf32> to vector<16x32xf32>
    %31 = arith.negf %30 : vector<16x32xf32>
    %32 = math.exp %31 : vector<16x32xf32>
    %cst_16 = arith.constant 1.000000e+00 : f32
    %33 = vector.broadcast %cst_16 : f32 to vector<16x32xf32>
    %34 = arith.addf %33, %32 : vector<16x32xf32>
    %35 = arith.divf %33, %34 : vector<16x32xf32>
    %36 = arith.subf %19, %29 : vector<16x32xf32>
    %37 = arith.mulf %35, %36 : vector<16x32xf32>
    %38 = arith.addf %29, %37 : vector<16x32xf32>
    %c0_17 = arith.constant 0 : index
    %c0_18 = arith.constant 0 : index
    %39 = vector.load %arg4[%c0_17, %c0_18] : memref<16x32xf32, #tpu.memory_space<vmem>>, vector<16x32xf32>
    tpu.vector_store %arg4[%c0_17, %c0_18], %38 {strides = array<i32>} : memref<16x32xf32, #tpu.memory_space<vmem>>, vector<16x32xf32>,
    return
  }
  func.func @transform_0(%arg0: i32) -> (i32, i32) {
    %c0_i32 = arith.constant 0 : i32
    %c0_i32_0 = arith.constant 0 : i32
    return %arg0, %c0_i32 : i32, i32
  }
  func.func @transform_1(%arg0: i32) -> (i32, i32, i32) {
    %c0_i32 = arith.constant 0 : i32
    %c0_i32_0 = arith.constant 0 : i32
    %c0_i32_1 = arith.constant 0 : i32
    %c0_i32_2 = arith.constant 0 : i32
    return %c0_i32, %c0_i32_0, %c0_i32_1 : i32, i32, i32
  }
  func.func @transform_2(%arg0: i32) -> (i32, i32, i32) {
    %c0_i32 = arith.constant 0 : i32
    %c0_i32_0 = arith.constant 0 : i32
    %c0_i32_1 = arith.constant 0 : i32
    %c0_i32_2 = arith.constant 0 : i32
    return %c0_i32, %c0_i32_0, %c0_i32_1 : i32, i32, i32
  }
  func.func @transform_3(%arg0: i32) -> (i32, i32) {
    %c0_i32 = arith.constant 0 : i32
    %c0_i32_0 = arith.constant 0 : i32
    return %arg0, %c0_i32 : i32, i32
  }
}

</mosaic_0001>

<bundles_post_ra>
// kernel: highway_forward.1
= control target key start
LH: loop header
LB: loop body
LE: loop exit
PB: predicated region body
PF: predicated region fallthrough
CT: control target
= control target key end

     0   :  { %8 = vsyncpa [#allocation3], 0  ;;  %s472_s0 = inlined_call_operand.hbm [shape: f32[16,32], index: 0, kind: input, shape index: {}]   ;;  %s473_s1 = inlined_call_operand.hbm [shape: f32[2,32,256], index: 1, kind: input, shape index: {}]   ;;  %s474_s2 = inlined_call_operand.vmem [shape: f32[2,1,256], index: 2, kind: input, shape index: {}]   ;;  %s475_s3 = inlined_call_operand.hbm [shape: f32[16,32], index: 3, kind: output, shape index: {}]  }
   0x1   :  { %9 = vsyncpa [#allocation6], 0 }
   0x2   :  { %10 = vsyncpa [#allocation4], 0  ;;  %s413_s12 = smov [#allocation2]  }
   0x3   :  { %s16_s13 = sshll.u32 %s413_s12, 4  ;;  %s17_s13 = int_to_ptr.vmem [resolvable:$true] %s16_s13 }
   0x4   :  { %s355_s14 = scalar_lea.vmem %s17_s13, 256  ;;  %p360_p1 = scmp.lt.s32.totalorder %s17_s13, %s17_s13 }
   0x5   :  { %p356_p0 = scmp.ne.s32.totalorder %s17_s13, %s355_s14  ;;  %p361_p2 = scmp.lt.s32.totalorder %s355_s14, %s355_s14 }
   0x7   :  { %p362_p3 = por %p361_p2, %p360_p1 }
   0x9   :  { %p363_p4 = pnand %p362_p3, %p356_p0 }
   0xb   :  { %366 = shalt.err (!%p363_p4)
}
   0xc   :  { %s414_s15 = smov 128   ;;  %s415_s16 = smov 8  }
   0xd   :  { %22 = dma.hbm_to_vmem [thread:$0]  %s472_s0, 256, %s17_s13, [#allocation3], %s414_s15, %s414_s15, %s415_s16  }
   0xe   :  { %s416_s19 = smov [#allocation5]  }
   0xf   :  { %s28_s20 = sshll.u32 %s416_s19, 4  ;;  %s29_s20 = int_to_ptr.vmem [resolvable:$true] %s28_s20 }
  0x10   :  { %s375_s21 = scalar_lea.vmem %s29_s20, 2048  ;;  %p380_p6 = scmp.lt.s32.totalorder %s29_s20, %s29_s20 }
  0x11   :  { %p376_p5 = scmp.ne.s32.totalorder %s29_s20, %s375_s21  ;;  %p381_p7 = scmp.lt.s32.totalorder %s375_s21, %s375_s21 }
  0x13   :  { %p382_p8 = por %p381_p7, %p380_p6 }
  0x15   :  { %p383_p9 = pnand %p382_p8, %p376_p5 }
  0x17   :  { %386 = shalt.err (!%p383_p9)
}
  0x18   :  { %s417_s22 = smov 256   ;;  %s418_s23 = smov 16  }
  0x19   :  { %34 = dma.hbm_to_vmem [thread:$0]  %s473_s1, 2048, %s29_s20, [#allocation6], %s417_s22, %s417_s22, %s418_s23  }
  0x1a   :  { %407 = dma.done.wait [#allocation3], 256  }
  0x1b   :  { %408 = vsyncadd [#allocation3], 4294967040 }
  0x1c   :  { %409 = dma.done.wait [#allocation6], 2048  }
  0x1d   :  { %410 = vsyncadd [#allocation6], 4294965248  ;;  %v419_v0 = vmov 0.0   ;;  %v52_v1 = vld [vmem:[#allocation5 + $0x38] sm:$0xff]  ;;  %v51_v2 = vld [vmem:[#allocation5 + $0x30] sm:$0xff]  ;;  %vm65_vm0 = vcmask 261120   ;;  %v55_v19 = vlaneseq }
  0x1e   :  { %136 = vmatprep.mubr.f32.mxu0 %v419_v0  ;;  %261 = vmatprep.mubr.f32.mxu1 %v419_v0  ;;  %v50_v3 = vld [vmem:[#allocation5 + $0x28] sm:$0xff]  ;;  %v49_v4 = vld [vmem:[#allocation5 + $0x20] sm:$0xff]  ;;  %v48_v5 = vld [vmem:[#allocation5 + $0x18] sm:$0xff] }
  0x1f   :  { %96 = vmatprep.subr.mxu0 %v52_v1  ;;  %v47_v6 = vld [vmem:[#allocation5 + $0x10] sm:$0xff]  ;;  %v46_v7 = vld [vmem:[#allocation5 + $0x8] sm:$0xff]  ;;  %v45_v8 = vld [vmem:[#allocation5] sm:$0xff]  ;;  %v56_v20 = vshrl.u32 %v55_v19, 7 }
  0x20   :  { %97 = vmatpush1.msra.mxu0 %v51_v2  ;;  %v43_v9 = vld [vmem:[#allocation2] sm:$0xff]  ;;  %v44_v10 = vld [vmem:[#allocation2 + $0x8] sm:$0xff]  ;;  %v175_v13 = vld [vmem:[#allocation5 + $0x68] sm:$0xff] }
  0x21   :  { %98 = vmatprep.subr.mxu0 %v50_v3  ;;  %v177_v11 = vld [vmem:[#allocation5 + $0x78] sm:$0xff]  ;;  %v176_v12 = vld [vmem:[#allocation5 + $0x70] sm:$0xff]  ;;  %v174_v14 = vld [vmem:[#allocation5 + $0x60] sm:$0xff]  ;;  %v61_v21 = vsub.s32 1, %v56_v20  ;;  %v57_v32 = vsub.s32 0, %v56_v20 }
  0x22   :  { %99 = vmatpush1.msra.mxu0 %v49_v4  ;;  %221 = vmatprep.subr.mxu1 %v177_v11  ;;  %v173_v15 = vld [vmem:[#allocation5 + $0x58] sm:$0xff]  ;;  %v172_v16 = vld [vmem:[#allocation5 + $0x50] sm:$0xff]  ;;  %v171_v17 = vld [vmem:[#allocation5 + $0x48] sm:$0xff] }
  0x23   :  { %100 = vmatprep.subr.mxu0 %v48_v5  ;;  %222 = vmatpush1.msra.mxu1 %v176_v12  ;;  %v170_v18 = vld [vmem:[#allocation5 + $0x40] sm:$0xff]  ;;  %v53_v22 = vld [vmem:[%s474_s2] sm:$0x3]  ;;  %v318_v50 = vld [vmem:[%s474_s2 + $0x2] sm:$0x3]  ;;  %s420_s2 = smov [#allocation7]  }
  0x24   :  { %101 = vmatpush1.msra.mxu0 %v47_v6  ;;  %223 = vmatprep.subr.mxu1 %v175_v13  ;;  %v62_v23 = vrot.slane %v53_v22, %v61_v21  ;;  %v58_v35 = vrot.slane %v53_v22, %v57_v32  ;;  %v188_v51 = vrot.slane %v318_v50, %v61_v21  ;;  %s301_s28 = sshll.u32 %s420_s2, 4  ;;  %s302_s28 = int_to_ptr.vmem [resolvable:$true] %s301_s28 }
  0x25   :  { %102 = vmatprep.subr.mxu0 %v46_v7  ;;  %224 = vmatpush1.msra.mxu1 %v174_v14  ;;  %v184_v62 = vrot.slane %v318_v50, %v57_v32  ;;  %s387_s29 = scalar_lea.vmem %s302_s28, 256  ;;  %p392_p11 = scmp.lt.s32.totalorder %s302_s28, %s302_s28 }
  0x26   :  { %103 = vmatpush1.msra.mxu0 %v45_v8  ;;  %225 = vmatprep.subr.mxu1 %v173_v15  ;;  %p388_p10 = scmp.ne.s32.totalorder %s302_s28, %s387_s29  ;;  %p393_p12 = scmp.lt.s32.totalorder %s387_s29, %s387_s29 }
  0x27   :  { %314 = vmatmul.mubr.msk.f32.vlgmr.msra.gmra.mxu0 %vm65_vm0, %v43_v9  ;;  %226 = vmatpush1.msra.mxu1 %v172_v16 }
  0x28   :  { %142 = vmatprep.mubr.f32.mxu0 %v419_v0  ;;  %227 = vmatprep.subr.mxu1 %v171_v17  ;;  %p394_p13 = por %p393_p12, %p392_p11 }
  0x29   :  { %228 = vmatpush1.msra.mxu1 %v170_v18 }
  0x2a   :  { %p395_p0 = pnand %p394_p13, %p388_p10 }
  0x2b   :  { %315 = vmatmul.mubr.msk.f32.gmra.mxu0 %vm65_vm0, %v44_v10 }
  0xe7   :  { %v138_v24 = vpop.f32.mrf.mxu0 }
  0xe8   :  { %v139_v38 = vadd.f32 %v138_v24, %v58_v35 }
  0xe9   :  { %v140_v25 = vpop.f32.mrf.mxu0 }
  0xea   :  { %v141_v26 = vadd.f32 %v140_v25, %v62_v23  ;;  %v149_v39 = vmax.f32 %v139_v38, 0.0 }
  0xeb   :  { %v144_v27 = vpop.f32.mrf.mxu0 }
  0xec   :  { %v316_v28 = vmul.f32 -1.442695, %v141_v26  ;;  %v145_v40 = vadd.f32 %v144_v27, %v58_v35  ;;  %v163_v41 = vsub.f32 %v43_v9, %v149_v39 }
  0xed   :  { %v146_v29 = vpop.f32.mrf.mxu0 }
  0xee   :  { %331 = vpow2.f32 %v316_v28  ;;  %v147_v30 = vadd.f32 %v146_v29, %v62_v23  ;;  %v150_v42 = vmax.f32 %v145_v40, 0.0 }
  0xf0   :  { %v317_v31 = vmul.f32 -1.442695, %v147_v30  ;;  %v164_v45 = vsub.f32 %v44_v10, %v150_v42 }
  0xf2   :  { %333 = vpow2.f32 %v317_v31 }
  0xfb   :  { %v332_v33 = vpop.eup %331 }
  0xfc   :  { %v157_v34 = vadd.f32 1.0, %v332_v33 }
  0xfe   :  { %335 = vrcp.f32 %v157_v34 }
  0xff   :  { %v334_v36 = vpop.eup %333 }
 0x100   :  { %v158_v37 = vadd.f32 1.0, %v334_v36 }
 0x102   :  { %337 = vrcp.f32 %v158_v37 }
 0x10b   :  { %v336_v43 = vpop.eup %335 }
 0x10c   :  { %v165_v44 = vmul.f32 %v336_v43, %v163_v41 }
 0x10e   :  { %v167_v46 = vadd.f32 %v165_v44, %v149_v39 }
 0x10f   :  { %v338_v47 = vpop.eup %337 }
 0x110   :  { %319 = vmatmul.mubr.msk.f32.vlgmr.msra.gmra.mxu1 %vm65_vm0, %v167_v46  ;;  %v166_v48 = vmul.f32 %v338_v47, %v164_v45 }
 0x111   :  { %267 = vmatprep.mubr.f32.mxu1 %v419_v0 }
 0x112   :  { %v168_v49 = vadd.f32 %v166_v48, %v150_v42 }
 0x114   :  { %320 = vmatmul.mubr.msk.f32.gmra.mxu1 %vm65_vm0, %v168_v49 }
 0x1d0   :  { %v263_v52 = vpop.f32.mrf.mxu1 }
 0x1d1   :  { %v264_v1 = vadd.f32 %v263_v52, %v184_v62 }
 0x1d2   :  { %v265_v53 = vpop.f32.mrf.mxu1 }
 0x1d3   :  { %v266_v54 = vadd.f32 %v265_v53, %v188_v51  ;;  %v274_v2 = vmax.f32 %v264_v1, 0.0 }
 0x1d4   :  { %v269_v55 = vpop.f32.mrf.mxu1 }
 0x1d5   :  { %v321_v56 = vmul.f32 -1.442695, %v266_v54  ;;  %v270_v3 = vadd.f32 %v269_v55, %v184_v62  ;;  %v288_v4 = vsub.f32 %v167_v46, %v274_v2 }
 0x1d6   :  { %v271_v57 = vpop.f32.mrf.mxu1 }
 0x1d7   :  { %339 = vpow2.f32 %v321_v56  ;;  %v272_v58 = vadd.f32 %v271_v57, %v188_v51  ;;  %v275_v5 = vmax.f32 %v270_v3, 0.0 }
 0x1d9   :  { %v322_v59 = vmul.f32 -1.442695, %v272_v58  ;;  %v289_v8 = vsub.f32 %v168_v49, %v275_v5 }
 0x1db   :  { %341 = vpow2.f32 %v322_v59 }
 0x1e4   :  { %v340_v60 = vpop.eup %339 }
 0x1e5   :  { %v282_v61 = vadd.f32 1.0, %v340_v60 }
 0x1e7   :  { %343 = vrcp.f32 %v282_v61 }
 0x1e8   :  { %v342_v63 = vpop.eup %341 }
 0x1e9   :  { %v283_v0 = vadd.f32 1.0, %v342_v63 }
 0x1eb   :  { %345 = vrcp.f32 %v283_v0 }
 0x1f4   :  { %v344_v6 = vpop.eup %343 }
 0x1f5   :  { %v290_v7 = vmul.f32 %v344_v6, %v288_v4 }
 0x1f7   :  { %v292_v9 = vadd.f32 %v290_v7, %v274_v2 }
 0x1f8   :  { %v346_v10 = vpop.eup %345 }
 0x1f9   :  { %v291_v11 = vmul.f32 %v346_v10, %v289_v8  ;;  %294 = vst.msk [vmem:[#allocation7] sm:$0xff] %vm65_vm0, %v292_v9 }
 0x1fb   :  { %v293_v12 = vadd.f32 %v291_v11, %v275_v5 }
 0x1fd   :  { %295 = vst.msk [vmem:[#allocation7 + $0x8] sm:$0xff] %vm65_vm0, %v293_v12 }
 0x1fe   :  { %398 = shalt.err (!%p395_p0)
}
 0x1ff   :  { %307 = dma.vmem_to_hbm [thread:$0]  %s302_s28, 256, %s475_s3, [#allocation4], %s414_s15, %s414_s15, %s415_s16  }
 0x200   :  { %411 = dma.done.wait [#allocation4], 256  }
 0x201   :  { %412 = vsyncadd [#allocation4], 4294967040 }
 0x202   :  { %311 = vsyncpa [#allocation3], 1 }
 0x203   :  { %312 = vsyncpa [#allocation6], 1 }
 0x204   :  { %313 = vsyncpa [#allocation4], 1 }

</bundles_post_ra>
